<compile_context>
chip_gen: v5e
topology: v5e:2x2
jax: 0.10.0
libtpu: 0.0.40
codegen_flags: <defaults>
</compile_context>

<pallas_src>
import functools

import jax
import jax.numpy as jnp
from jax.experimental import pallas as pl
from jax.experimental.pallas import tpu as pltpu  # noqa: F401  (TPU backend)


def _traj_kernel(x_ref, w_ref, b_ref, out_ref, *, unrolling):
    """Whole unrolled trajectory in one pass.

    x_ref:   (B, D)            input state
    w_ref:   (D, D)            weight of the inner Linear
    b_ref:   (1, D)            bias of the inner Linear
    out_ref: (B, unrolling, D) stacked trajectory (torch.stack(..., dim=1))
    """
    state = x_ref[...]          # loaded once, carried in vregs
    w = w_ref[...]              # loaded once
    b = b_ref[...]

    # Statically unrolled: the LLO scheduler sees the full dependency chain.
    for i in range(unrolling):
        # x_{t+1} = tanh(x_t @ W + b): matmul on MXU, tanh on EUP.
        state = jnp.tanh(
            jnp.dot(state, w, preferred_element_type=jnp.float32) + b
        )
        # Write directly in the stacked (B, unrolling, D) layout; i is static.
        out_ref[:, i, :] = state.astype(out_ref.dtype)


@functools.partial(jax.jit, static_argnames=("unrolling",))
def trajectory_model_pallas(x, w, b, unrolling):
    """x: (B, D) f32, w: (D, D), b: (1, D)  ->  (B, unrolling, D)."""
    B, D = x.shape
    kernel = functools.partial(_traj_kernel, unrolling=unrolling)

    return pl.pallas_call(
        kernel,
        out_shape=jax.ShapeDtypeStruct((B, unrolling, D), x.dtype),
        # grid=() : single invocation; index_maps take no grid arguments.
        in_specs=[
            pl.BlockSpec((B, D), lambda: (0, 0)),            # x
            pl.BlockSpec((D, D), lambda: (0, 0)),            # W
            pl.BlockSpec((1, D), lambda: (0, 0)),            # b
        ],
        out_specs=pl.BlockSpec((B, unrolling, D), lambda: (0, 0, 0)),
    )(x, w, b)


def trajectory_model_ref(x, w, b, unrolling):
    outs = []
    state = x
    for _ in range(unrolling):
        state = jnp.tanh(state @ w + b)
        outs.append(state)
    return jnp.stack(outs, axis=1)


if __name__ == "__main__":
    B, D, UNROLLING = 4, 32, 5

    key = jax.random.PRNGKey(0)
    kx, kw, kb = jax.random.split(key, 3)

    x = jax.random.normal(kx, (B, D), dtype=jnp.float32)
    # Deterministic parameters for the inner "model" (Linear D->D + tanh).
    w = jax.random.normal(kw, (D, D), dtype=jnp.float32) * 0.1
    b = jax.random.normal(kb, (1, D), dtype=jnp.float32) * 0.01

    out = trajectory_model_pallas(x, w, b, UNROLLING)
    out = jax.block_until_ready(out)

    ref = trajectory_model_ref(x, w, b, UNROLLING)

    assert out.shape == (B, UNROLLING, D), out.shape
    assert jnp.allclose(out, ref, atol=1e-5, rtol=1e-5), float(
        jnp.max(jnp.abs(out - ref))
    )

    print("KERNEL_OK")
</pallas_src>

<mosaic_0001>
module attributes {stable_mosaic.version = 11 : i64} {
  func.func @_traj_kernel(%arg0: memref<4x32xf32, #tpu.memory_space<vmem>>, %arg1: memref<32x32xf32, #tpu.memory_space<vmem>>, %arg2: memref<1x32xf32, #tpu.memory_space<vmem>>, %arg3: memref<4x5x32xf32, #tpu.memory_space<vmem>>) attributes {dimension_semantics = [], scalar_prefetch = 0 : i64, scratch_operands = 0 : i64, tpu.core_type = #tpu.core_type<tc>} {
    %c0 = arith.constant 0 : index
    %c0_0 = arith.constant 0 : index
    %0 = vector.load %arg0[%c0, %c0_0] : memref<4x32xf32, #tpu.memory_space<vmem>>, vector<4x32xf32>
    %c0_1 = arith.constant 0 : index
    %c0_2 = arith.constant 0 : index
    %1 = vector.load %arg1[%c0_1, %c0_2] : memref<32x32xf32, #tpu.memory_space<vmem>>, vector<32x32xf32>
    %c0_3 = arith.constant 0 : index
    %c0_4 = arith.constant 0 : index
    %2 = vector.load %arg2[%c0_3, %c0_4] : memref<1x32xf32, #tpu.memory_space<vmem>>, vector<1x32xf32>
    %cst = arith.constant dense<0.000000e+00> : vector<4x32xf32>
    %3 = tpu.matmul %0, %1, %cst {dimension_numbers = #tpu.dot_dimension_numbers<[1], [0], [0], [1], [0, 0, 1, 1], [], []>} : vector<4x32xf32>, vector<32x32xf32>, vector<4x32xf32> -> vector<4x32xf32>
    %4 = vector.broadcast %2 : vector<1x32xf32> to vector<4x32xf32>
    %5 = arith.addf %3, %4 : vector<4x32xf32>
    %6 = math.tanh %5 : vector<4x32xf32>
    %c0_5 = arith.constant 0 : index
    %c0_6 = arith.constant 0 : index
    %c0_7 = arith.constant 0 : index
    %7 = vector.load %arg3[%c0_5, %c0_6, %c0_7] : memref<4x5x32xf32, #tpu.memory_space<vmem>>, vector<4x1x32xf32>
    %8 = vector.shape_cast %7 : vector<4x1x32xf32> to vector<4x32xf32>
    %9 = vector.shape_cast %6 : vector<4x32xf32> to vector<4x1x32xf32>
    tpu.vector_store %arg3[%c0_5, %c0_6, %c0_7], %9 {strides = array<i32>} : memref<4x5x32xf32, #tpu.memory_space<vmem>>, vector<4x1x32xf32>,
    %cst_8 = arith.constant dense<0.000000e+00> : vector<4x32xf32>
    %10 = tpu.matmul %6, %1, %cst_8 {dimension_numbers = #tpu.dot_dimension_numbers<[1], [0], [0], [1], [0, 0, 1, 1], [], []>} : vector<4x32xf32>, vector<32x32xf32>, vector<4x32xf32> -> vector<4x32xf32>
    %11 = vector.broadcast %2 : vector<1x32xf32> to vector<4x32xf32>
    %12 = arith.addf %10, %11 : vector<4x32xf32>
    %13 = math.tanh %12 : vector<4x32xf32>
    %c0_9 = arith.constant 0 : index
    %c1 = arith.constant 1 : index
    %c0_10 = arith.constant 0 : index
    %14 = vector.load %arg3[%c0_9, %c1, %c0_10] : memref<4x5x32xf32, #tpu.memory_space<vmem>>, vector<4x1x32xf32>
    %15 = vector.shape_cast %14 : vector<4x1x32xf32> to vector<4x32xf32>
    %16 = vector.shape_cast %13 : vector<4x32xf32> to vector<4x1x32xf32>
    tpu.vector_store %arg3[%c0_9, %c1, %c0_10], %16 {strides = array<i32>} : memref<4x5x32xf32, #tpu.memory_space<vmem>>, vector<4x1x32xf32>,
    %cst_11 = arith.constant dense<0.000000e+00> : vector<4x32xf32>
    %17 = tpu.matmul %13, %1, %cst_11 {dimension_numbers = #tpu.dot_dimension_numbers<[1], [0], [0], [1], [0, 0, 1, 1], [], []>} : vector<4x32xf32>, vector<32x32xf32>, vector<4x32xf32> -> vector<4x32xf32>
    %18 = vector.broadcast %2 : vector<1x32xf32> to vector<4x32xf32>
    %19 = arith.addf %17, %18 : vector<4x32xf32>
    %20 = math.tanh %19 : vector<4x32xf32>
    %c0_12 = arith.constant 0 : index
    %c2 = arith.constant 2 : index
    %c0_13 = arith.constant 0 : index
    %21 = vector.load %arg3[%c0_12, %c2, %c0_13] : memref<4x5x32xf32, #tpu.memory_space<vmem>>, vector<4x1x32xf32>
    %22 = vector.shape_cast %21 : vector<4x1x32xf32> to vector<4x32xf32>
    %23 = vector.shape_cast %20 : vector<4x32xf32> to vector<4x1x32xf32>
    tpu.vector_store %arg3[%c0_12, %c2, %c0_13], %23 {strides = array<i32>} : memref<4x5x32xf32, #tpu.memory_space<vmem>>, vector<4x1x32xf32>,
    %cst_14 = arith.constant dense<0.000000e+00> : vector<4x32xf32>
    %24 = tpu.matmul %20, %1, %cst_14 {dimension_numbers = #tpu.dot_dimension_numbers<[1], [0], [0], [1], [0, 0, 1, 1], [], []>} : vector<4x32xf32>, vector<32x32xf32>, vector<4x32xf32> -> vector<4x32xf32>
    %25 = vector.broadcast %2 : vector<1x32xf32> to vector<4x32xf32>
    %26 = arith.addf %24, %25 : vector<4x32xf32>
    %27 = math.tanh %26 : vector<4x32xf32>
    %c0_15 = arith.constant 0 : index
    %c3 = arith.constant 3 : index
    %c0_16 = arith.constant 0 : index
    %28 = vector.load %arg3[%c0_15, %c3, %c0_16] : memref<4x5x32xf32, #tpu.memory_space<vmem>>, vector<4x1x32xf32>
    %29 = vector.shape_cast %28 : vector<4x1x32xf32> to vector<4x32xf32>
    %30 = vector.shape_cast %27 : vector<4x32xf32> to vector<4x1x32xf32>
    tpu.vector_store %arg3[%c0_15, %c3, %c0_16], %30 {strides = array<i32>} : memref<4x5x32xf32, #tpu.memory_space<vmem>>, vector<4x1x32xf32>,
    %cst_17 = arith.constant dense<0.000000e+00> : vector<4x32xf32>
    %31 = tpu.matmul %27, %1, %cst_17 {dimension_numbers = #tpu.dot_dimension_numbers<[1], [0], [0], [1], [0, 0, 1, 1], [], []>} : vector<4x32xf32>, vector<32x32xf32>, vector<4x32xf32> -> vector<4x32xf32>
    %32 = vector.broadcast %2 : vector<1x32xf32> to vector<4x32xf32>
    %33 = arith.addf %31, %32 : vector<4x32xf32>
    %34 = math.tanh %33 : vector<4x32xf32>
    %c0_18 = arith.constant 0 : index
    %c4 = arith.constant 4 : index
    %c0_19 = arith.constant 0 : index
    %35 = vector.load %arg3[%c0_18, %c4, %c0_19] : memref<4x5x32xf32, #tpu.memory_space<vmem>>, vector<4x1x32xf32>
    %36 = vector.shape_cast %35 : vector<4x1x32xf32> to vector<4x32xf32>
    %37 = vector.shape_cast %34 : vector<4x32xf32> to vector<4x1x32xf32>
    tpu.vector_store %arg3[%c0_18, %c4, %c0_19], %37 {strides = array<i32>} : memref<4x5x32xf32, #tpu.memory_space<vmem>>, vector<4x1x32xf32>,
    return
  }
}

</mosaic_0001>

<bundles_post_ra>
// kernel: trajectory_model_pallas.1
= control target key start
LH: loop header
LB: loop body
LE: loop exit
PB: predicated region body
PF: predicated region fallthrough
CT: control target
= control target key end

     0   :  { %8 = vsyncpa [#allocation3], 0  ;;  %s422_s0 = inlined_call_operand.hbm [shape: f32[4,32], index: 0, kind: input, shape index: {}]   ;;  %s423_s1 = inlined_call_operand.hbm [shape: f32[32,32], index: 1, kind: input, shape index: {}]   ;;  %s424_s2 = inlined_call_operand.vmem [shape: f32[1,32], index: 2, kind: input, shape index: {}]   ;;  %s425_s3 = inlined_call_operand.vmem [shape: f32[4,5,32], index: 3, kind: output, shape index: {}]  }
   0x1   :  { %s15_s14 = sshll.u32 %s422_s0, 4  ;;  %s16_s14 = int_to_ptr.hbm [resolvable:$true] %s15_s14 }
   0x2   :  { %9 = vsyncpa [#allocation5], 0  ;;  %s304_s15 = smov [#allocation2]   ;;  %s25_s19 = sshll.u32 %s423_s1, 4  ;;  %s26_s19 = int_to_ptr.hbm [resolvable:$true] %s25_s19 }
   0x3   :  { %s17_s16 = sshll.u32 %s304_s15, 4  ;;  %s305_s20 = smov [#allocation4]   ;;  %s18_s16 = int_to_ptr.vmem [resolvable:$true] %s17_s16 }
   0x4   :  { %20 = dma.hbm_to_vmem [thread:$0]  %s16_s14, 64, %s18_s16, [#allocation3]  }
   0x5   :  { %s27_s21 = sshll.u32 %s305_s20, 4  ;;  %s306_s22 = smov 128   ;;  %s28_s21 = int_to_ptr.vmem [resolvable:$true] %s27_s21 }
   0x6   :  { %s307_s23 = smov 8  }
   0x7   :  { %33 = dma.hbm_to_vmem [thread:$0]  %s26_s19, 512, %s28_s21, [#allocation5], %s306_s22, %s306_s22, %s307_s23  }
   0x8   :  { %300 = dma.done.wait [#allocation3], 64  }
   0x9   :  { %301 = vsyncadd [#allocation3], 4294967232 }
   0xa   :  { %302 = dma.done.wait [#allocation5], 512  }
   0xb   :  { %303 = vsyncadd [#allocation5], 4294966784  ;;  %v48_v0 = vld [vmem:[#allocation4 + $0x18] sm:$0xff]  ;;  %v47_v1 = vld [vmem:[#allocation4 + $0x10] sm:$0xff]  ;;  %vm53_vm0 = vcmask 261120   ;;  %vm85_vm1 = vcmask 253952  }
   0xc   :  { %69 = vmatpush.msra.mxu0 %v48_v0  ;;  %104 = vmatpush.msra.mxu1 %v48_v0  ;;  %v46_v2 = vld [vmem:[#allocation4 + $0x8] sm:$0xff]  ;;  %v45_v3 = vld [vmem:[#allocation4] sm:$0xff]  ;;  %v44_v4 = vld [vmem:[#allocation2] sm:$0xf] }
   0xd   :  { %138 = vmatpush.msra.mxu2 %v48_v0  ;;  %172 = vmatpush.msra.mxu3 %v48_v0  ;;  %v241_v5 = vld [vmem:[%s424_s2] ss:$0 sm:$0xff] }
   0xe   :  { %70 = vmatpush.msra.mxu0 %v47_v1  ;;  %105 = vmatpush.msra.mxu1 %v47_v1 }
   0xf   :  { %139 = vmatpush.msra.mxu2 %v47_v1  ;;  %173 = vmatpush.msra.mxu3 %v47_v1 }
  0x10   :  { %71 = vmatpush.msra.mxu0 %v46_v2  ;;  %106 = vmatpush.msra.mxu1 %v46_v2 }
  0x11   :  { %140 = vmatpush.msra.mxu2 %v46_v2  ;;  %174 = vmatpush.msra.mxu3 %v46_v2 }
  0x12   :  { %72 = vmatpush.msra.mxu0 %v45_v3  ;;  %107 = vmatpush.msra.mxu1 %v45_v3 }
  0x13   :  { %232 = vmatmul.msk.f32.vlgmr.msra.gmra.mxu0 %vm53_vm0, %v44_v4  ;;  %141 = vmatpush.msra.mxu2 %v45_v3 }
  0x14   :  { %175 = vmatpush.msra.mxu3 %v45_v3  ;;  %206 = vmatpush.msrb.mxu0 %v48_v0 }
  0x16   :  { %207 = vmatpush.msrb.mxu0 %v47_v1 }
  0x18   :  { %208 = vmatpush.msrb.mxu0 %v46_v2 }
  0x1a   :  { %209 = vmatpush.msrb.mxu0 %v45_v3 }
  0x90   :  { %v74_v6 = vpop.f32.mrf.mxu0 }
  0x91   :  { %v75_v7 = vadd.f32 %v241_v5, %v74_v6 }
  0x93   :  { %242 = vtanh.f32 %v75_v7 }
  0x99   :  { %v243_v8 = vpop.eup %242 }
  0x9a   :  { %v79_v9 = vrot.slane %v243_v8, 1  ;;  %v80_v10 = vrot.slane %v243_v8, 2  ;;  %v81_v11 = vrot.slane %v243_v8, 3  ;;  %86 = vst.msk [vmem:[%s425_s3] sm:$0x1] %vm85_vm1, %v243_v8  ;;  %233 = vmatmul.msk.f32.vlgmr.msra.gmra.mxu1 %vm53_vm0, %v243_v8 }
  0x9c   :  { %87 = vst.msk [vmem:[%s425_s3 + $0x8] sm:$0x1] %vm85_vm1, %v79_v9 }
  0x9d   :  { %88 = vst.msk [vmem:[%s425_s3 + $0x10] sm:$0x1] %vm85_vm1, %v80_v10 }
  0x9e   :  { %89 = vst.msk [vmem:[%s425_s3 + $0x18] sm:$0x1] %vm85_vm1, %v81_v11 }
 0x117   :  { %v109_v12 = vpop.f32.mrf.mxu1 }
 0x118   :  { %v110_v13 = vadd.f32 %v241_v5, %v109_v12 }
 0x11a   :  { %244 = vtanh.f32 %v110_v13 }
 0x120   :  { %v245_v14 = vpop.eup %244 }
 0x121   :  { %v114_v15 = vrot.slane %v245_v14, 1  ;;  %v115_v16 = vrot.slane %v245_v14, 2  ;;  %v116_v17 = vrot.slane %v245_v14, 3  ;;  %120 = vst.msk [vmem:[%s425_s3 + $0x1] sm:$0x1] %vm85_vm1, %v245_v14  ;;  %234 = vmatmul.msk.f32.vlgmr.msra.gmra.mxu2 %vm53_vm0, %v245_v14 }
 0x123   :  { %121 = vst.msk [vmem:[%s425_s3 + $0x9] sm:$0x1] %vm85_vm1, %v114_v15 }
 0x124   :  { %122 = vst.msk [vmem:[%s425_s3 + $0x11] sm:$0x1] %vm85_vm1, %v115_v16 }
 0x125   :  { %123 = vst.msk [vmem:[%s425_s3 + $0x19] sm:$0x1] %vm85_vm1, %v116_v17 }
 0x1a4   :  { %v143_v18 = vpop.f32.mrf.mxu2 }
 0x1a5   :  { %v144_v19 = vadd.f32 %v241_v5, %v143_v18 }
 0x1a7   :  { %246 = vtanh.f32 %v144_v19 }
 0x1ad   :  { %v247_v20 = vpop.eup %246 }
 0x1ae   :  { %v148_v21 = vrot.slane %v247_v20, 1  ;;  %v149_v22 = vrot.slane %v247_v20, 2  ;;  %v150_v23 = vrot.slane %v247_v20, 3  ;;  %154 = vst.msk [vmem:[%s425_s3 + $0x2] sm:$0x1] %vm85_vm1, %v247_v20  ;;  %235 = vmatmul.msk.f32.vlgmr.msra.gmra.mxu3 %vm53_vm0, %v247_v20 }
 0x1b0   :  { %155 = vst.msk [vmem:[%s425_s3 + $0xa] sm:$0x1] %vm85_vm1, %v148_v21 }
 0x1b1   :  { %156 = vst.msk [vmem:[%s425_s3 + $0x12] sm:$0x1] %vm85_vm1, %v149_v22 }
 0x1b2   :  { %157 = vst.msk [vmem:[%s425_s3 + $0x1a] sm:$0x1] %vm85_vm1, %v150_v23 }
 0x231   :  { %v177_v24 = vpop.f32.mrf.mxu3 }
 0x232   :  { %v178_v25 = vadd.f32 %v241_v5, %v177_v24 }
 0x234   :  { %248 = vtanh.f32 %v178_v25 }
 0x23a   :  { %v249_v26 = vpop.eup %248 }
 0x23b   :  { %v182_v27 = vrot.slane %v249_v26, 1  ;;  %v183_v28 = vrot.slane %v249_v26, 2  ;;  %v184_v29 = vrot.slane %v249_v26, 3  ;;  %188 = vst.msk [vmem:[%s425_s3 + $0x3] sm:$0x1] %vm85_vm1, %v249_v26  ;;  %236 = vmatmul.msk.f32.vlgmr.msrb.gmra.mxu0 %vm53_vm0, %v249_v26 }
 0x23d   :  { %189 = vst.msk [vmem:[%s425_s3 + $0xb] sm:$0x1] %vm85_vm1, %v182_v27 }
 0x23e   :  { %190 = vst.msk [vmem:[%s425_s3 + $0x13] sm:$0x1] %vm85_vm1, %v183_v28 }
 0x23f   :  { %191 = vst.msk [vmem:[%s425_s3 + $0x1b] sm:$0x1] %vm85_vm1, %v184_v29 }
 0x2b8   :  { %v211_v30 = vpop.f32.mrf.mxu0 }
 0x2b9   :  { %v212_v31 = vadd.f32 %v241_v5, %v211_v30 }
 0x2bb   :  { %250 = vtanh.f32 %v212_v31 }
 0x2c1   :  { %v251_v32 = vpop.eup %250 }
 0x2c2   :  { %v216_v33 = vrot.slane %v251_v32, 1  ;;  %v217_v34 = vrot.slane %v251_v32, 2  ;;  %v218_v35 = vrot.slane %v251_v32, 3  ;;  %222 = vst.msk [vmem:[%s425_s3 + $0x4] sm:$0x1] %vm85_vm1, %v251_v32 }
 0x2c4   :  { %223 = vst.msk [vmem:[%s425_s3 + $0xc] sm:$0x1] %vm85_vm1, %v216_v33 }
 0x2c5   :  { %224 = vst.msk [vmem:[%s425_s3 + $0x14] sm:$0x1] %vm85_vm1, %v217_v34 }
 0x2c6   :  { %225 = vst.msk [vmem:[%s425_s3 + $0x1c] sm:$0x1] %vm85_vm1, %v218_v35 }
 0x2c7   :  { %230 = vsyncpa [#allocation3], 1 }
 0x2c8   :  { %231 = vsyncpa [#allocation5], 1 }

</bundles_post_ra>
